<compile_context>
chip_gen: v6e
topology: v6e:2x2x1
jax: 0.10.0
libtpu: 0.0.40
codegen_flags: <defaults>
</compile_context>

<pallas_src>
import math

import jax
import jax.numpy as jnp
from jax import lax
from jax.experimental import pallas as pl
from jax.experimental.pallas import tpu as pltpu


def discriminator_kernel(x_ref, w_ref, b_ref, o_ref):
    # x_ref: (TB, D) VMEM   w_ref: (1, D) VMEM   b_ref: (1,) SMEM   o_ref: (1, TB) VMEM
    # Contract over D with the x tile as the (transposed) RHS -> lane-dense (1, TB).
    logits = lax.dot_general(
        w_ref[...],
        x_ref[...],
        dimension_numbers=(((1,), (1,)), ((), ())),
        preferred_element_type=jnp.float32,
    )
    logits = logits + b_ref[0]  # scalar add from SMEM (no vector-path cost)
    o_ref[...] = jax.nn.sigmoid(logits).astype(o_ref.dtype)


def _round_up(n, m):
    return ((n + m - 1) // m) * m


def discriminator_forward(x, weight, bias):
    """x: (B, D) f32, weight: (1, D) (PyTorch nn.Linear layout), bias: (1,)."""
    B, D = x.shape
    assert weight.shape == (1, D)
    bias = bias.reshape(1).astype(jnp.float32)

    # Batch tile: big enough to amortize the ~0.35us/step overhead, small enough
    # that two double-buffered x tiles fit comfortably in v7x's 64 MiB VMEM.
    if B > 512:
        tb = 512
        while tb > 128 and 2 * tb * D * 4 > (8 << 20):
            tb //= 2  # stays a multiple of 128 -> lane/sublane divisibility holds
    else:
        tb = max(8, _round_up(B, 8))  # single grid step: block == full array dims

    b_pad = _round_up(B, tb)
    if b_pad != B:
        x = jnp.pad(x, ((0, b_pad - B), (0, 0)))  # padded rows are sliced off below
    grid = (b_pad // tb,)

    # Explicit scoped-VMEM limit with headroom (safe on v5e/v6e/v7x).
    vmem_bytes = 2 * tb * D * 4 + 2 * D * 4 + 2 * tb * 4
    vmem_limit = int(min(max(4 * vmem_bytes, 16 << 20), 32 << 20))

    out = pl.pallas_call(
        discriminator_kernel,
        out_shape=jax.ShapeDtypeStruct((1, b_pad), jnp.float32),
        grid_spec=pltpu.PrefetchScalarGridSpec(
            num_scalar_prefetch=0,
            grid=grid,
            in_specs=[
                pl.BlockSpec((tb, D), lambda i: (i, 0)),             # x: streamed tiles
                pl.BlockSpec((1, D), lambda i: (0, 0)),              # W: resident
                pl.BlockSpec(memory_space=pltpu.MemorySpace.SMEM),   # bias scalar in SMEM
            ],
            out_specs=pl.BlockSpec((1, tb), lambda i: (0, i)),       # lane-dense logits slab
        ),
        compiler_params=pltpu.CompilerParams(
            dimension_semantics=("parallel",),
            vmem_limit_bytes=vmem_limit,
        ),
    )(x, weight, bias)

    # (1, b_pad) lane-dense slab -> PyTorch-shaped (B, 1) output (layout plumbing only).
    return out[:, :B].reshape(B, 1)


def init_discriminator_params(key, bottleneck_dim=256):
    # nn.init.kaiming_uniform_ (a=0, fan_in mode, leaky_relu gain=sqrt(2)):
    #   bound = sqrt(6 / fan_in)
    kw, kb = jax.random.split(key)
    fan_in = bottleneck_dim
    w_bound = math.sqrt(6.0 / fan_in)
    weight = jax.random.uniform(
        kw, (1, bottleneck_dim), jnp.float32, minval=-w_bound, maxval=w_bound
    )
    # default nn.Linear bias init: U(-1/sqrt(fan_in), 1/sqrt(fan_in))
    b_bound = 1.0 / math.sqrt(fan_in)
    bias = jax.random.uniform(
        kb, (1,), jnp.float32, minval=-b_bound, maxval=b_bound
    )
    return weight, bias


if __name__ == "__main__":
    key = jax.random.PRNGKey(0)
    k_x, k_p = jax.random.split(key)

    bottleneck_dim = 256
    batch = 8
    x = jax.random.normal(k_x, (batch, bottleneck_dim), jnp.float32)
    weight, bias = init_discriminator_params(k_p, bottleneck_dim)

    out = discriminator_forward(x, weight, bias)
    out = jax.block_until_ready(out)

    # reference check in plain JAX
    ref = jax.nn.sigmoid(x @ weight.T + bias)
    assert out.shape == (batch, 1)
    assert jnp.allclose(out, ref, atol=1e-5, rtol=1e-5)

    print("KERNEL_OK")
</pallas_src>

<mosaic_0001>
module attributes {stable_mosaic.version = 11 : i64} {
  func.func @discriminator_kernel(%arg0: i32, %arg1: memref<8x256xf32, #tpu.memory_space<vmem>>, %arg2: memref<1x256xf32, #tpu.memory_space<vmem>>, %arg3: memref<1xf32, #tpu.memory_space<smem>>, %arg4: memref<1x8xf32, #tpu.memory_space<vmem>>) attributes {dimension_semantics = [#tpu.dimension_semantics<parallel>], iteration_bounds = array<i64: 1>, scalar_prefetch = 0 : i64, scratch_operands = 0 : i64, tpu.core_type = #tpu.core_type<tc>, window_params = [{transform_indices = @transform_0, window_bounds = array<i64: 8, 256>}, {pipeline_mode = #tpu.pipeline_mode<synchronous>, transform_indices = @transform_1, window_bounds = array<i64: 1, 256>}, {transform_indices = @transform_2, window_bounds = array<i64: 1>}, {transform_indices = @transform_3, window_bounds = array<i64: 1, 8>}]} {
    %c0 = arith.constant 0 : index
    %c0_0 = arith.constant 0 : index
    %0 = vector.load %arg2[%c0, %c0_0] : memref<1x256xf32, #tpu.memory_space<vmem>>, vector<1x256xf32>
    %c0_1 = arith.constant 0 : index
    %c0_2 = arith.constant 0 : index
    %1 = vector.load %arg1[%c0_1, %c0_2] : memref<8x256xf32, #tpu.memory_space<vmem>>, vector<8x256xf32>
    %cst = arith.constant dense<0.000000e+00> : vector<1x8xf32>
    %2 = tpu.matmul %0, %1, %cst {dimension_numbers = #tpu.dot_dimension_numbers<[1], [1], [0], [0], [0, 0, 1, 0], [], []>} : vector<1x256xf32>, vector<8x256xf32>, vector<1x8xf32> -> vector<1x8xf32>
    %c0_3 = arith.constant 0 : index
    %3 = memref.load %arg3[%c0_3] : memref<1xf32, #tpu.memory_space<smem>>
    %4 = vector.broadcast %3 : f32 to vector<1x8xf32>
    %5 = arith.addf %2, %4 : vector<1x8xf32>
    %6 = arith.negf %5 : vector<1x8xf32>
    %7 = math.exp %6 : vector<1x8xf32>
    %cst_4 = arith.constant 1.000000e+00 : f32
    %8 = vector.broadcast %cst_4 : f32 to vector<1x8xf32>
    %9 = arith.addf %8, %7 : vector<1x8xf32>
    %10 = arith.divf %8, %9 : vector<1x8xf32>
    %c0_5 = arith.constant 0 : index
    %c0_6 = arith.constant 0 : index
    %11 = vector.load %arg4[%c0_5, %c0_6] : memref<1x8xf32, #tpu.memory_space<vmem>>, vector<1x8xf32>
    tpu.vector_store %arg4[%c0_5, %c0_6], %10 {strides = array<i32>} : memref<1x8xf32, #tpu.memory_space<vmem>>, vector<1x8xf32>,
    return
  }
  func.func @transform_0(%arg0: i32) -> (i32, i32) {
    %c0_i32 = arith.constant 0 : i32
    %c0_i32_0 = arith.constant 0 : i32
    return %arg0, %c0_i32 : i32, i32
  }
  func.func @transform_1(%arg0: i32) -> (i32, i32) {
    %c0_i32 = arith.constant 0 : i32
    %c0_i32_0 = arith.constant 0 : i32
    %c0_i32_1 = arith.constant 0 : i32
    return %c0_i32, %c0_i32_0 : i32, i32
  }
  func.func @transform_2(%arg0: i32) -> i32 {
    %c0_i32 = arith.constant 0 : i32
    %c0_i32_0 = arith.constant 0 : i32
    return %c0_i32 : i32
  }
  func.func @transform_3(%arg0: i32) -> (i32, i32) {
    %c0_i32 = arith.constant 0 : i32
    %c0_i32_0 = arith.constant 0 : i32
    return %c0_i32, %arg0 : i32, i32
  }
}

</mosaic_0001>

<bundles_post_ra>
// kernel: tpu_custom_call.1
= control target key start
LH: loop header
LB: loop body
LE: loop exit
PB: predicated region body
PF: predicated region fallthrough
CT: control target
= control target key end

     0   :  { %9 = vsyncpa [#allocation4], 0  ;;  %s222_s0 = inlined_call_operand.hbm [shape: f32[8,256], index: 0, kind: input, shape index: {}]   ;;  %s223_s1 = inlined_call_operand.vmem [shape: f32[1,256], index: 1, kind: input, shape index: {}]   ;;  %s224_s2 = inlined_call_operand.<no memory space> [shape: f32[1], index: 2, kind: input, shape index: {}]   ;;  %s225_s3 = inlined_call_operand.hbm [shape: f32[1,8], index: 3, kind: output, shape index: {}]  }
   0x1   :  { %10 = vsyncpa [#allocation5], 0  ;;  %s188_s12 = smov [#allocation3]  }
   0x2   :  { %s17_s13 = sshll.u32 %s188_s12, 4  ;;  %s18_s13 = int_to_ptr.vmem [resolvable:$true] %s17_s13 }
   0x3   :  { %s152_s14 = scalar_lea.vmem %s18_s13, 256  ;;  %p157_p1 = scmp.lt.s32.totalorder %s18_s13, %s18_s13 }
   0x4   :  { %p153_p0 = scmp.ne.s32.totalorder %s18_s13, %s152_s14  ;;  %p158_p2 = scmp.lt.s32.totalorder %s152_s14, %s152_s14 }
   0x6   :  { %p159_p3 = por %p158_p2, %p157_p1 }
   0x8   :  { %p160_p4 = pnand %p159_p3, %p153_p0 }
   0xa   :  { %163 = shalt.err (!%p160_p4)
}
   0xb   :  { %20 = dma.hbm_to_vmem [thread:$0]  %s222_s0, 256, %s18_s13, [#allocation4]  }
   0xc   :  { %184 = dma.done.wait [#allocation4], 256  }
   0xd   :  { %185 = vsyncadd [#allocation4], 4294967040  ;;  %v34_v0 = vlaneseq  ;;  %v30_v4 = vld [vmem:[#allocation3 + $0x8] sm:$0xff]  ;;  %v29_v5 = vld [vmem:[#allocation3] sm:$0xff]  ;;  %v32_v9 = vstv %s224_s2  ;;  %s189_s20 = smov [#allocation6]   ;;  %vm120_vm0 = vcmask 57344  }
   0xe   :  { %v28_v6 = vld [vmem:[%s223_s1] sm:$0x3]  ;;  %74 = vmatprep.subr.mxu0 %v30_v4  ;;  %s128_s1 = sshll.u32 %s189_s20, 4  ;;  %s129_s1 = int_to_ptr.vmem [resolvable:$true] %s128_s1 }
   0xf   :  { %v35_v1 = vshrl.u32 %v34_v0, 7  ;;  %75 = vmatpush1.xpose.msra.mxu0 %v29_v5  ;;  %s164_s21 = scalar_lea.vmem %s129_s1, 16  ;;  %s168_s22 = scalar_lea.vmem %s129_s1, 32 }
  0x10   :  { %p165_p5 = scmp.ne.s32.totalorder %s129_s1, %s164_s21  ;;  %p169_p6 = scmp.lt.s32.totalorder %s129_s1, %s129_s1 }
  0x11   :  { %v36_v2 = vsub.s32 0, %v35_v1  ;;  %v40_v3 = vsub.s32 1, %v35_v1  ;;  %p170_p7 = scmp.lt.s32.totalorder %s168_s22, %s164_s21 }
  0x13   :  { %v37_v7 = vrot.slane %v28_v6, %v36_v2  ;;  %v41_v8 = vrot.slane %v28_v6, %v40_v3  ;;  %p171_p8 = por %p170_p7, %p169_p6 }
  0x15   :  { %108 = vmatprep.mubr.f32.mxu0 %v41_v8  ;;  %p172_p9 = pnand %p171_p8, %p165_p5 }
  0x16   :  { %109 = vmatmul.mubr.f32.vlgmr.msra.gmra.mxu0 %v37_v7 }
  0xd6   :  { %v110_v10 = vpop.f32.mrf.mxu0 }
  0xd7   :  { %v111_v11 = vadd.f32 %v110_v10, %v32_v9 }
  0xd8   :  { %v112_v12 = vpop.f32.mrf.mxu0 }
  0xd9   :  { %v137_v13 = vmul.f32 -1.442695, %v111_v11 }
  0xdb   :  { %140 = vpow2.f32 %v137_v13 }
  0xe8   :  { %v141_v14 = vpop.eup %140 }
  0xe9   :  { %v117_v15 = vadd.f32 1.0, %v141_v14 }
  0xeb   :  { %142 = vrcp.f32 %v117_v15 }
  0xf8   :  { %v143_v16 = vpop.eup %142 }
  0xf9   :  { %121 = vst.msk [vmem:[#allocation6] sm:$0x1] %vm120_vm0, %v143_v16 }
  0xfa   :  { %175 = shalt.err (!%p172_p9)
}
  0xfb   :  { %131 = dma.vmem_to_hbm [thread:$0]  %s129_s1, 16, %s225_s3, [#allocation5]  }
  0xfc   :  { %186 = dma.done.wait [#allocation5], 16  }
  0xfd   :  { %187 = vsyncadd [#allocation5], 4294967280 }
  0xfe   :  { %135 = vsyncpa [#allocation4], 1 }
  0xff   :  { %136 = vsyncpa [#allocation5], 1 }

</bundles_post_ra>
